<compile_context>
chip_gen: v5e
topology: v5e:2x2
jax: 0.10.0
libtpu: 0.0.40
codegen_flags: <defaults>
</compile_context>

<pallas_src>
import jax
import jax.numpy as jnp
from jax.experimental import pallas as pl
from jax.experimental.pallas import tpu as pltpu


# ----------------------------------- small helpers ------------------------------------
def _round_up(x, m):
    return ((x + m - 1) // m) * m


def _largest_divisor_le(n, cap):
    best = 1
    for d in range(1, n + 1):
        if n % d == 0 and d <= cap:
            best = d
    return best


def _num_tensorcores():
    # v7x has 2 TensorCores per chip; v5e/v6e have 1.
    try:
        kind = jax.devices()[0].device_kind.lower()
        if "v7" in kind:
            return 2
    except Exception:
        pass
    return 1


def _vmem_limit(est_bytes):
    # estimated block bytes * 2 + headroom, clamped to stay under v7x's 64 MiB physical.
    return int(min(max(2 * est_bytes + (2 << 20), 8 << 20), 48 << 20))


def _pick_tm(M, target=512):
    if M <= target:
        return M
    for t in range(target, 7, -8):
        if M % t == 0:
            return t
    return M  # fallback: whole extent (block == full dim is always legal)


def _pick_tb(B):
    tb = B
    if _num_tensorcores() >= 2 and B % 16 == 0:
        tb = B // 2                      # shard the parallel axis across both TCs
    # cap per-tile rows (vreg budget at Hp=128) while keeping a divisor of B
    while tb > 64 and tb % 2 == 0 and (B % (tb // 2) == 0):
        tb //= 2
    if tb != B and tb % 8 != 0:          # (8,128) block constraint on second-last dim
        tb = B
    return tb


def _pick_ts(S, tb, G, budget_bytes=2 << 20):
    per_step = max(tb * G * 2, 1)        # bf16 xg bytes per timestep
    return _largest_divisor_le(S, max(1, budget_bytes // per_step))


# ----------------------- matmul + bias kernel (input projection / fc) ------------------
def _matmul_bias_kernel(x_ref, w_ref, b_ref, o_ref):
    o_ref[...] = (
        jnp.dot(x_ref[...], w_ref[...], preferred_element_type=jnp.float32)
        + b_ref[...]
    ).astype(o_ref.dtype)


def matmul_bias(x2d, w, b, out_dtype=jnp.bfloat16):
    """x2d: (M, K) bf16, w: (K, N) bf16, b: (1, N) f32 -> (M, N) out_dtype, M-tiled."""
    M, K = x2d.shape
    N = w.shape[1]
    tm = _pick_tm(M)
    est = (2 * tm * K * 2 + 2 * K * N * 2 + N * 4
           + 2 * tm * N * jnp.dtype(out_dtype).itemsize)
    return pl.pallas_call(
        _matmul_bias_kernel,
        out_shape=jax.ShapeDtypeStruct((M, N), out_dtype),
        grid_spec=pltpu.PrefetchScalarGridSpec(
            num_scalar_prefetch=0,
            grid=(M // tm,),
            in_specs=[
                pl.BlockSpec((tm, K), lambda i: (i, 0)),
                pl.BlockSpec((K, N), lambda i: (0, 0)),
                pl.BlockSpec((1, N), lambda i: (0, 0)),
            ],
            out_specs=pl.BlockSpec((tm, N), lambda i: (i, 0)),
        ),
        compiler_params=pltpu.CompilerParams(
            dimension_semantics=("parallel",),
            vmem_limit_bytes=_vmem_limit(est)),
    )(x2d, w, b)


# ------------------------------- LSTM recurrence kernel --------------------------------
def _sigmoid(x):
    # sigmoid(x) = 0.5 * tanh(0.5 x) + 0.5 : one EUP push instead of exp + reciprocal.
    return 0.5 * jnp.tanh(0.5 * x) + 0.5


def _lstm_recurrent_kernel(xg_ref, whh_ref, out_ref, h_sc, c_sc):
    # xg_ref : (ts, tb, 4*Hp) bf16   precomputed x@W_ih + bias (time chunk)
    # whh_ref: (Hp, 4*Hp)     bf16   recurrent weights (pre-transposed, zero-padded)
    # out_ref: (ts, tb, Hp)   bf16   hidden states for this chunk
    # h_sc/c_sc: (tb, Hp) f32 scratch -- persists across the time-chunk grid axis
    ts = xg_ref.shape[0]
    Hp = out_ref.shape[2]

    @pl.when(pl.program_id(1) == 0)
    def _():
        h_sc[...] = jnp.zeros_like(h_sc)
        c_sc[...] = jnp.zeros_like(c_sc)

    def step(t, carry):
        h, c = carry
        gates = xg_ref[t].astype(jnp.float32) + jnp.dot(
            h.astype(jnp.bfloat16), whh_ref[...],
            preferred_element_type=jnp.float32)
        # gate slices are 128-lane aligned (Hp multiple of 128): free vreg views
        i = _sigmoid(gates[:, 0 * Hp:1 * Hp])
        f = _sigmoid(gates[:, 1 * Hp:2 * Hp])
        g = jnp.tanh(gates[:, 2 * Hp:3 * Hp])
        o = _sigmoid(gates[:, 3 * Hp:4 * Hp])
        c = f * c + i * g
        h = o * jnp.tanh(c)
        out_ref[t] = h.astype(out_ref.dtype)
        return h, c

    h, c = jax.lax.fori_loop(0, ts, step, (h_sc[...], c_sc[...]), unroll=4)
    h_sc[...] = h
    c_sc[...] = c


def lstm_recurrence(xg_tm, whh):
    """xg_tm: (S, B, 4*Hp) bf16 pre-activations; whh: (Hp, 4*Hp) bf16 -> (S, B, Hp) bf16."""
    S, B, G = xg_tm.shape
    Hp = whh.shape[0]
    tb = _pick_tb(B)
    ts = _pick_ts(S, tb, G)
    est = (2 * ts * tb * G * 2 + 2 * Hp * G * 2
           + 2 * ts * tb * Hp * 2 + 2 * tb * Hp * 4)
    return pl.pallas_call(
        _lstm_recurrent_kernel,
        out_shape=jax.ShapeDtypeStruct((S, B, Hp), jnp.bfloat16),
        grid_spec=pltpu.PrefetchScalarGridSpec(
            num_scalar_prefetch=0,
            grid=(B // tb, S // ts),
            in_specs=[
                pl.BlockSpec((ts, tb, G), lambda b, s: (s, b, 0)),
                pl.BlockSpec((Hp, G), lambda b, s: (0, 0)),
            ],
            out_specs=pl.BlockSpec((ts, tb, Hp), lambda b, s: (s, b, 0)),
            scratch_shapes=[pltpu.VMEM((tb, Hp), jnp.float32),
                            pltpu.VMEM((tb, Hp), jnp.float32)],
        ),
        compiler_params=pltpu.CompilerParams(
            dimension_semantics=("parallel", "arbitrary"),
            vmem_limit_bytes=_vmem_limit(est)),
    )(xg_tm, whh)


# -------------------- fc over all hidden states (time-major accumulation) --------------
def _fc_time_kernel(h_ref, w_ref, b_ref, o_ref, acc_ref):
    s = pl.program_id(0)

    @pl.when(s == 0)
    def _():
        acc_ref[...] = jnp.zeros_like(acc_ref)

    tsf = h_ref.shape[0]

    def body(t, _):
        acc_ref[...] += jnp.dot(h_ref[t], w_ref[t],
                                preferred_element_type=jnp.float32)
        return 0

    jax.lax.fori_loop(0, tsf, body, 0, unroll=True)

    @pl.when(s == pl.num_programs(0) - 1)
    def _():
        o_ref[...] = (acc_ref[...] + b_ref[...]).astype(o_ref.dtype)


def fc_over_time(h_tm, w_t, b):
    """h_tm: (S, B, Hp) bf16; w_t: (S, Hp, Dp) bf16; b: (1, Dp) f32 -> (B, Dp) f32."""
    S, B, Hp = h_tm.shape
    Dp = w_t.shape[2]
    tsf = _largest_divisor_le(S, 16)
    est = (2 * tsf * B * Hp * 2 + 2 * tsf * Hp * Dp * 2
           + Dp * 4 + 3 * B * Dp * 4)
    return pl.pallas_call(
        _fc_time_kernel,
        out_shape=jax.ShapeDtypeStruct((B, Dp), jnp.float32),
        grid_spec=pltpu.PrefetchScalarGridSpec(
            num_scalar_prefetch=0,
            grid=(S // tsf,),
            in_specs=[
                pl.BlockSpec((tsf, B, Hp), lambda s: (s, 0, 0)),
                pl.BlockSpec((tsf, Hp, Dp), lambda s: (s, 0, 0)),
                pl.BlockSpec((1, Dp), lambda s: (0, 0)),
            ],
            out_specs=pl.BlockSpec((B, Dp), lambda s: (0, 0)),
            scratch_shapes=[pltpu.VMEM((B, Dp), jnp.float32)],
        ),
        compiler_params=pltpu.CompilerParams(
            dimension_semantics=("arbitrary",),
            vmem_limit_bytes=_vmem_limit(est)),
    )(h_tm, w_t, b)


# --------------------------- parameter init (PyTorch layout) ---------------------------
def init_params(key, input_size, hidden_size, n_layers, output_size, seq_len,
                use_all_h=True):
    params = {"lstm": []}
    k_lstm = 1.0 / jnp.sqrt(hidden_size)
    for layer in range(n_layers):
        in_l = input_size if layer == 0 else hidden_size
        key, k1, k2, k3, k4 = jax.random.split(key, 5)
        params["lstm"].append({
            "w_ih": jax.random.uniform(k1, (4 * hidden_size, in_l),
                                       jnp.float32, -k_lstm, k_lstm),
            "w_hh": jax.random.uniform(k2, (4 * hidden_size, hidden_size),
                                       jnp.float32, -k_lstm, k_lstm),
            "b_ih": jax.random.uniform(k3, (4 * hidden_size,),
                                       jnp.float32, -k_lstm, k_lstm),
            "b_hh": jax.random.uniform(k4, (4 * hidden_size,),
                                       jnp.float32, -k_lstm, k_lstm),
        })
    fc_in = hidden_size * seq_len if use_all_h else hidden_size
    k_fc = 1.0 / jnp.sqrt(fc_in)
    key, k1, k2 = jax.random.split(key, 3)
    params["fc_w"] = jax.random.uniform(k1, (output_size, fc_in),
                                        jnp.float32, -k_fc, k_fc)
    params["fc_b"] = jax.random.uniform(k2, (output_size,),
                                        jnp.float32, -k_fc, k_fc)
    return params


# ----------------- one-time weight prep: transpose + lane-pad + bf16 cast --------------
def _prep_gate_weight(w, H, Hp, in_pad):
    """PyTorch gate weight (4H, in) -> kernel layout (in_pad, 4*Hp), zero-padded."""
    in_dim = w.shape[1]
    w = w.reshape(4, H, in_dim)
    w = jnp.pad(w, ((0, 0), (0, Hp - H), (0, in_pad - in_dim)))
    return jnp.transpose(w, (2, 0, 1)).reshape(in_pad, 4 * Hp)


def prepare_params(params, hidden_size, use_all_h=True):
    H = hidden_size
    Hp = _round_up(H, 128)                               # lane-dense hidden width
    prepped = {"lstm": [], "Hp": Hp, "use_all_h": use_all_h}
    for li, layer in enumerate(params["lstm"]):
        w_ih, w_hh = layer["w_ih"], layer["w_hh"]
        in_pad = w_ih.shape[1] if li == 0 else Hp        # layers>0 consume padded h
        prepped["lstm"].append({
            "wih": _prep_gate_weight(w_ih, H, Hp, in_pad).astype(jnp.bfloat16),
            "whh": _prep_gate_weight(w_hh, H, Hp, Hp).astype(jnp.bfloat16),
            "b": jnp.pad((layer["b_ih"] + layer["b_hh"]).reshape(4, H),
                         ((0, 0), (0, Hp - H))).reshape(1, 4 * Hp).astype(jnp.float32),
        })
    fc_w, fc_b = params["fc_w"], params["fc_b"]
    Dout = fc_w.shape[0]
    Dp = _round_up(Dout, 128)                            # lane-dense fc output
    if use_all_h:
        S = fc_w.shape[1] // H
        w = fc_w.reshape(Dout, S, H)
        w = jnp.pad(w, ((0, Dp - Dout), (0, 0), (0, Hp - H)))
        w = jnp.transpose(w, (1, 2, 0))                  # (S, Hp, Dp) time-major
    else:
        w = jnp.transpose(jnp.pad(fc_w, ((0, Dp - Dout), (0, Hp - H))))  # (Hp, Dp)
    prepped["fc_w"] = w.astype(jnp.bfloat16)
    prepped["fc_b"] = jnp.pad(fc_b, (0, Dp - Dout)).reshape(1, Dp).astype(jnp.float32)
    prepped["Dout"] = Dout
    return prepped


# --------------------------------------- forward ---------------------------------------
def lstm_module_forward(prepped, x):
    """x: (batch, seq_len, input_size) — PyTorch batch_first convention."""
    Hp = prepped["Hp"]
    B, S, F = x.shape
    x_tm = jnp.transpose(x, (1, 0, 2))                   # time-major (S, B, F)
    feat = x_tm.reshape(S * B, F).astype(jnp.bfloat16)
    out_tm = None
    for layer in prepped["lstm"]:
        # hoisted input projection + bias: one big MXU matmul for all timesteps (bf16 out)
        xg = matmul_bias(feat, layer["wih"], layer["b"])                   # (S*B,4Hp) bf16
        out_tm = lstm_recurrence(xg.reshape(S, B, 4 * Hp), layer["whh"])   # (S,B,Hp) bf16
        feat = out_tm.reshape(S * B, Hp)                 # next layer's input, already bf16
        # TODO(synk): nn.LSTM inter-layer dropout is training-only; eval forward = no-op.
    if prepped["use_all_h"]:
        # fc accumulated over time in time-major order (no wrapper transpose);
        # padded hidden lanes are exactly 0 so padded fc-weight columns contribute 0.
        logits = fc_over_time(out_tm, prepped["fc_w"], prepped["fc_b"])    # (B, Dp) f32
    else:
        logits = matmul_bias(out_tm[-1], prepped["fc_w"], prepped["fc_b"],
                             out_dtype=jnp.float32)                        # (B, Dp) f32
    return logits[:, : prepped["Dout"]]


# ------------------------------- pure-JAX f32 reference --------------------------------
def _ref_lstm_layer(x_tm, w_ih, w_hh, b_ih, b_hh):
    S, B, _ = x_tm.shape
    H = w_hh.shape[1]

    def step(carry, x_t):
        h, c = carry
        gates = x_t @ w_ih.T + h @ w_hh.T + b_ih + b_hh
        i, f, g, o = jnp.split(gates, 4, axis=-1)
        i = jax.nn.sigmoid(i)
        f = jax.nn.sigmoid(f)
        g = jnp.tanh(g)
        o = jax.nn.sigmoid(o)
        c = f * c + i * g
        h = o * jnp.tanh(c)
        return (h, c), h

    init = (jnp.zeros((B, H), jnp.float32), jnp.zeros((B, H), jnp.float32))
    _, hs = jax.lax.scan(step, init, x_tm)
    return hs


def _ref_forward(params, x, use_all_h=True):
    h = jnp.transpose(x, (1, 0, 2))
    for layer in params["lstm"]:
        h = _ref_lstm_layer(h, layer["w_ih"], layer["w_hh"],
                            layer["b_ih"], layer["b_hh"])
    out = jnp.transpose(h, (1, 0, 2))
    out = out.reshape(out.shape[0], -1) if use_all_h else out[:, -1, :]
    return out @ params["fc_w"].T + params["fc_b"]


# ------------------------------------------ main ---------------------------------------
if __name__ == "__main__":
    batch, seq_len, input_size = 8, 8, 4
    hidden_size, n_layers, output_size = 32, 2, 1
    use_all_h = True

    key = jax.random.PRNGKey(0)
    key, kx = jax.random.split(key)
    x = jax.random.normal(kx, (batch, seq_len, input_size), jnp.float32)
    params = init_params(key, input_size, hidden_size, n_layers,
                         output_size, seq_len, use_all_h)
    prepped = prepare_params(params, hidden_size, use_all_h)

    out = jax.block_until_ready(lstm_module_forward(prepped, x))
    ref = jax.block_until_ready(_ref_forward(params, x, use_all_h))

    assert out.shape == (batch, output_size), out.shape
    # Matmuls use bf16 operands / bf16 inter-kernel intermediates with f32 accumulation
    # -> compare at bf16-level tolerance.
    assert jnp.allclose(out, ref, atol=2e-2, rtol=2e-2), (out, ref)

    print("KERNEL_OK")
</pallas_src>

<mosaic_0001>
module attributes {stable_mosaic.version = 11 : i64} {
  func.func @_matmul_bias_kernel(%arg0: i32, %arg1: memref<64x4xbf16, #tpu.memory_space<vmem>>, %arg2: memref<4x512xbf16, #tpu.memory_space<vmem>>, %arg3: memref<1x512xf32, #tpu.memory_space<vmem>>, %arg4: memref<64x512xbf16, #tpu.memory_space<vmem>>) attributes {dimension_semantics = [#tpu.dimension_semantics<parallel>], iteration_bounds = array<i64: 1>, scalar_prefetch = 0 : i64, scratch_operands = 0 : i64, tpu.core_type = #tpu.core_type<tc>, window_params = [{transform_indices = @transform_0, window_bounds = array<i64: 64, 4>}, {pipeline_mode = #tpu.pipeline_mode<synchronous>, transform_indices = @transform_1, window_bounds = array<i64: 4, 512>}, {pipeline_mode = #tpu.pipeline_mode<synchronous>, transform_indices = @transform_2, window_bounds = array<i64: 1, 512>}, {transform_indices = @transform_3, window_bounds = array<i64: 64, 512>}]} {
    %c0 = arith.constant 0 : index
    %c0_0 = arith.constant 0 : index
    %0 = vector.load %arg1[%c0, %c0_0] : memref<64x4xbf16, #tpu.memory_space<vmem>>, vector<64x4xbf16>
    %c0_1 = arith.constant 0 : index
    %c0_2 = arith.constant 0 : index
    %1 = vector.load %arg2[%c0_1, %c0_2] : memref<4x512xbf16, #tpu.memory_space<vmem>>, vector<4x512xbf16>
    %cst = arith.constant dense<0.000000e+00> : vector<64x512xf32>
    %2 = tpu.matmul %0, %1, %cst {dimension_numbers = #tpu.dot_dimension_numbers<[1], [0], [0], [1], [0, 0, 1, 1], [], []>} : vector<64x4xbf16>, vector<4x512xbf16>, vector<64x512xf32> -> vector<64x512xf32>
    %c0_3 = arith.constant 0 : index
    %c0_4 = arith.constant 0 : index
    %3 = vector.load %arg3[%c0_3, %c0_4] : memref<1x512xf32, #tpu.memory_space<vmem>>, vector<1x512xf32>
    %4 = vector.broadcast %3 : vector<1x512xf32> to vector<64x512xf32>
    %5 = arith.addf %2, %4 : vector<64x512xf32>
    %6 = arith.truncf %5 : vector<64x512xf32> to vector<64x512xbf16>
    %c0_5 = arith.constant 0 : index
    %c0_6 = arith.constant 0 : index
    %7 = vector.load %arg4[%c0_5, %c0_6] : memref<64x512xbf16, #tpu.memory_space<vmem>>, vector<64x512xbf16>
    tpu.vector_store %arg4[%c0_5, %c0_6], %6 {strides = array<i32>} : memref<64x512xbf16, #tpu.memory_space<vmem>>, vector<64x512xbf16>,
    return
  }
  func.func @transform_0(%arg0: i32) -> (i32, i32) {
    %c0_i32 = arith.constant 0 : i32
    %c0_i32_0 = arith.constant 0 : i32
    return %arg0, %c0_i32 : i32, i32
  }
  func.func @transform_1(%arg0: i32) -> (i32, i32) {
    %c0_i32 = arith.constant 0 : i32
    %c0_i32_0 = arith.constant 0 : i32
    %c0_i32_1 = arith.constant 0 : i32
    return %c0_i32, %c0_i32_0 : i32, i32
  }
  func.func @transform_2(%arg0: i32) -> (i32, i32) {
    %c0_i32 = arith.constant 0 : i32
    %c0_i32_0 = arith.constant 0 : i32
    %c0_i32_1 = arith.constant 0 : i32
    return %c0_i32, %c0_i32_0 : i32, i32
  }
  func.func @transform_3(%arg0: i32) -> (i32, i32) {
    %c0_i32 = arith.constant 0 : i32
    %c0_i32_0 = arith.constant 0 : i32
    return %arg0, %c0_i32 : i32, i32
  }
}

</mosaic_0001>

<bundles_post_ra>
// kernel: tpu_custom_call.1
= control target key start
LH: loop header
LB: loop body
LE: loop exit
PB: predicated region body
PF: predicated region fallthrough
CT: control target
= control target key end

     0   :  { %s414_s0 = inlined_call_operand.vmem [shape: bf16[64,4], index: 0, kind: input, shape index: {}]   ;;  %s415_s1 = inlined_call_operand.vmem [shape: bf16[4,512], index: 1, kind: input, shape index: {}]   ;;  %s416_s2 = inlined_call_operand.vmem [shape: f32[1,512], index: 2, kind: input, shape index: {}]   ;;  %s417_s3 = inlined_call_operand.hbm [shape: bf16[64,512], index: 3, kind: output, shape index: {}]  }
   0x1   :  { %v24_v0 = vld [vmem:[%s415_s1] sm:$0xff] }
   0x2   :  { %56 = vst [vmem:[#allocation1] ss:$4 sm:$0xff] %v24_v0 }
   0x3   :  { %8 = vsyncpa [#allocation3], 0  ;;  %vm74_vm0 = vcmask 1041408   ;;  %v281_v6 = vld [vmem:[%s414_s0] sm:$0xff]  ;;  %vm61_vm1 = vcmask 31744   ;;  %v282_v10 = vld [vmem:[%s414_s0 + $0x8] sm:$0xff] }
   0x4   :  { %v283_v11 = vld [vmem:[%s414_s0 + $0x10] sm:$0xff]  ;;  %v284_v12 = vld [vmem:[%s414_s0 + $0x18] sm:$0xff]  ;;  %v25_v13 = vld [vmem:[%s416_s2] sm:$0xf]  ;;  %s314_s0 = smov [#allocation2]   ;;  %s237_s25 = sshll.u32 %s417_s3, 4  ;;  %s238_s25 = int_to_ptr.hbm [resolvable:$true] %s237_s25 }
   0x5   :  { %v371_v14 = vperm.slane %v25_v13, 0  ;;  %v373_v15 = vperm.slane %v25_v13, 1  ;;  %v377_v21 = vperm.slane %v25_v13, 2  ;;  %v379_v22 = vperm.slane %v25_v13, 3  ;;  %s235_s2 = sshll.u32 %s314_s0, 4  ;;  %s315_s26 = smov 256   ;;  %s236_s2 = int_to_ptr.vmem [resolvable:$true] %s235_s2 }
   0x6   :  { %s316_s27 = smov 16  }
   0x9   :  { %v57_v1 = vld.sshfl [vmem:[#allocation1] sm:$0xff pattern:$0x73625140]  ;;  %v58_v2 = vld.sshfl [vmem:[#allocation1 + $0x8] sm:$0xff pattern:$0x73625140] }
   0xa   :  { %v75_v3 = vsel %vm74_vm0, %v57_v1, 0  ;;  %v77_v4 = vsel %vm74_vm0, %v58_v2, 0  ;;  %v59_v5 = vld.sshfl [vmem:[#allocation1 + $0x10] sm:$0xff pattern:$0x73625140] }
   0xb   :  { %90 = vmatpush.bf16.msra.mxu0 %v75_v3  ;;  %119 = vmatpush.bf16.msra.mxu1 %v77_v4  ;;  %v79_v7 = vsel %vm74_vm0, %v59_v5, 0  ;;  %v60_v8 = vld.sshfl [vmem:[#allocation1 + $0x18] sm:$0xff pattern:$0x73625140] }
   0xc   :  { %148 = vmatpush.bf16.msra.mxu2 %v79_v7  ;;  %v81_v9 = vsel %vm74_vm0, %v60_v8, 0 }
   0xd   :  { %177 = vmatpush.bf16.msra.mxu3 %v81_v9 }
   0xe   :  { %265 = vmatmul.msk.bf16.vlgmr.msra.gmra.mxu0 %vm61_vm1, %v281_v6  ;;  %269 = vmatmul.msk.bf16.vlgmr.msra.gmra.mxu1 %vm61_vm1, %v281_v6 }
   0xf   :  { %273 = vmatmul.msk.bf16.vlgmr.msra.gmra.mxu2 %vm61_vm1, %v281_v6 }
  0x10   :  { %277 = vmatmul.msk.bf16.vlgmr.msra.gmra.mxu3 %vm61_vm1, %v281_v6 }
  0x1e   :  { %266 = vmatmul.msk.bf16.gmra.mxu0 %vm61_vm1, %v282_v10  ;;  %270 = vmatmul.msk.bf16.gmra.mxu1 %vm61_vm1, %v282_v10 }
  0x1f   :  { %274 = vmatmul.msk.bf16.gmra.mxu2 %vm61_vm1, %v282_v10 }
  0x20   :  { %278 = vmatmul.msk.bf16.gmra.mxu3 %vm61_vm1, %v282_v10 }
  0x2e   :  { %267 = vmatmul.msk.bf16.gmra.mxu0 %vm61_vm1, %v283_v11  ;;  %271 = vmatmul.msk.bf16.gmra.mxu1 %vm61_vm1, %v283_v11 }
  0x2f   :  { %275 = vmatmul.msk.bf16.gmra.mxu2 %vm61_vm1, %v283_v11 }
  0x30   :  { %279 = vmatmul.msk.bf16.gmra.mxu3 %vm61_vm1, %v283_v11 }
  0x3e   :  { %268 = vmatmul.msk.bf16.gmra.mxu0 %vm61_vm1, %v284_v12  ;;  %272 = vmatmul.msk.bf16.gmra.mxu1 %vm61_vm1, %v284_v12 }
  0x3f   :  { %276 = vmatmul.msk.bf16.gmra.mxu2 %vm61_vm1, %v284_v12 }
  0x40   :  { %280 = vmatmul.msk.bf16.gmra.mxu3 %vm61_vm1, %v284_v12 }
  0x8b   :  { %v92_v16 = vpop.f32.mrf.mxu0  ;;  %v121_v17 = vpop.f32.mrf.mxu1 }
  0x8c   :  { %v93_v18 = vadd.f32 %v92_v16, %v371_v14  ;;  %v122_v19 = vadd.f32 %v121_v17, %v373_v15 }
  0x8e   :  { %v199_v20 = vpack.c.bf16 %v122_v19, %v93_v18 }
  0x90   :  { %215 = vst [vmem:[#allocation2] sm:$0xff] %v199_v20 }
  0x92   :  { %v150_v23 = vpop.f32.mrf.mxu2 }
  0x93   :  { %v151_v24 = vadd.f32 %v150_v23, %v377_v21  ;;  %v179_v25 = vpop.f32.mrf.mxu3  ;;  %v94_v26 = vpop.f32.mrf.mxu0 }
  0x94   :  { %v180_v27 = vadd.f32 %v179_v25, %v379_v22  ;;  %v95_v28 = vadd.f32 %v94_v26, %v371_v14  ;;  %v123_v29 = vpop.f32.mrf.mxu1 }
  0x95   :  { %v124_v30 = vadd.f32 %v123_v29, %v373_v15 }
  0x96   :  { %v200_v31 = vpack.c.bf16 %v180_v27, %v151_v24 }
  0x97   :  { %v201_v32 = vpack.c.bf16 %v124_v30, %v95_v28 }
  0x98   :  { %216 = vst [vmem:[#allocation2 + $0x8] sm:$0xff] %v200_v31 }
  0x99   :  { %217 = vst [vmem:[#allocation2 + $0x10] sm:$0xff] %v201_v32 }
  0x9a   :  { %v152_v33 = vpop.f32.mrf.mxu2 }
  0x9b   :  { %v153_v34 = vadd.f32 %v152_v33, %v377_v21  ;;  %v181_v35 = vpop.f32.mrf.mxu3  ;;  %v97_v36 = vpop.f32.mrf.mxu0 }
  0x9c   :  { %v182_v37 = vadd.f32 %v181_v35, %v379_v22  ;;  %v98_v38 = vadd.f32 %v97_v36, %v371_v14  ;;  %v126_v39 = vpop.f32.mrf.mxu1 }
  0x9d   :  { %v127_v40 = vadd.f32 %v126_v39, %v373_v15 }
  0x9e   :  { %v202_v41 = vpack.c.bf16 %v182_v37, %v153_v34 }
  0x9f   :  { %v203_v42 = vpack.c.bf16 %v127_v40, %v98_v38 }
  0xa0   :  { %218 = vst [vmem:[#allocation2 + $0x18] sm:$0xff] %v202_v41 }
  0xa1   :  { %219 = vst [vmem:[#allocation2 + $0x20] sm:$0xff] %v203_v42 }
  0xa2   :  { %v155_v43 = vpop.f32.mrf.mxu2 }
  0xa3   :  { %v156_v44 = vadd.f32 %v155_v43, %v377_v21  ;;  %v184_v45 = vpop.f32.mrf.mxu3  ;;  %v99_v46 = vpop.f32.mrf.mxu0 }
  0xa4   :  { %v185_v47 = vadd.f32 %v184_v45, %v379_v22  ;;  %v100_v48 = vadd.f32 %v99_v46, %v371_v14  ;;  %v128_v49 = vpop.f32.mrf.mxu1 }
  0xa5   :  { %v129_v50 = vadd.f32 %v128_v49, %v373_v15 }
  0xa6   :  { %v204_v51 = vpack.c.bf16 %v185_v47, %v156_v44 }
  0xa7   :  { %v205_v52 = vpack.c.bf16 %v129_v50, %v100_v48 }
  0xa8   :  { %220 = vst [vmem:[#allocation2 + $0x28] sm:$0xff] %v204_v51 }
  0xa9   :  { %221 = vst [vmem:[#allocation2 + $0x30] sm:$0xff] %v205_v52 }
  0xaa   :  { %v157_v53 = vpop.f32.mrf.mxu2 }
  0xab   :  { %v158_v54 = vadd.f32 %v157_v53, %v377_v21  ;;  %v186_v55 = vpop.f32.mrf.mxu3  ;;  %v102_v56 = vpop.f32.mrf.mxu0 }
  0xac   :  { %v187_v57 = vadd.f32 %v186_v55, %v379_v22  ;;  %v103_v58 = vadd.f32 %v102_v56, %v371_v14  ;;  %v131_v59 = vpop.f32.mrf.mxu1 }
  0xad   :  { %v132_v60 = vadd.f32 %v131_v59, %v373_v15 }
  0xae   :  { %v206_v61 = vpack.c.bf16 %v187_v57, %v158_v54 }
  0xaf   :  { %v207_v62 = vpack.c.bf16 %v132_v60, %v103_v58 }
  0xb0   :  { %222 = vst [vmem:[#allocation2 + $0x38] sm:$0xff] %v206_v61 }
  0xb1   :  { %223 = vst [vmem:[#allocation2 + $0x40] sm:$0xff] %v207_v62 }
  0xb2   :  { %v160_v63 = vpop.f32.mrf.mxu2 }
  0xb3   :  { %v161_v0 = vadd.f32 %v160_v63, %v377_v21  ;;  %v189_v1 = vpop.f32.mrf.mxu3  ;;  %v104_v2 = vpop.f32.mrf.mxu0 }
  0xb4   :  { %v190_v3 = vadd.f32 %v189_v1, %v379_v22  ;;  %v105_v4 = vadd.f32 %v104_v2, %v371_v14  ;;  %v133_v5 = vpop.f32.mrf.mxu1 }
  0xb5   :  { %v134_v6 = vadd.f32 %v133_v5, %v373_v15 }
  0xb6   :  { %v208_v7 = vpack.c.bf16 %v190_v3, %v161_v0 }
  0xb7   :  { %v209_v8 = vpack.c.bf16 %v134_v6, %v105_v4 }
  0xb8   :  { %224 = vst [vmem:[#allocation2 + $0x48] sm:$0xff] %v208_v7 }
  0xb9   :  { %225 = vst [vmem:[#allocation2 + $0x50] sm:$0xff] %v209_v8 }
  0xba   :  { %v162_v9 = vpop.f32.mrf.mxu2 }
  0xbb   :  { %v163_v10 = vadd.f32 %v162_v9, %v377_v21  ;;  %v191_v11 = vpop.f32.mrf.mxu3  ;;  %v107_v12 = vpop.f32.mrf.mxu0 }
  0xbc   :  { %v192_v13 = vadd.f32 %v191_v11, %v379_v22  ;;  %v108_v16 = vadd.f32 %v107_v12, %v371_v14  ;;  %v136_v17 = vpop.f32.mrf.mxu1 }
  0xbd   :  { %v137_v18 = vadd.f32 %v136_v17, %v373_v15 }
  0xbe   :  { %v210_v19 = vpack.c.bf16 %v192_v13, %v163_v10 }
  0xbf   :  { %v211_v20 = vpack.c.bf16 %v137_v18, %v108_v16 }
  0xc0   :  { %226 = vst [vmem:[#allocation2 + $0x58] sm:$0xff] %v210_v19 }
  0xc1   :  { %227 = vst [vmem:[#allocation2 + $0x60] sm:$0xff] %v211_v20 }
  0xc2   :  { %v165_v23 = vpop.f32.mrf.mxu2 }
  0xc3   :  { %v166_v24 = vadd.f32 %v165_v23, %v377_v21  ;;  %v194_v25 = vpop.f32.mrf.mxu3  ;;  %v109_v26 = vpop.f32.mrf.mxu0 }
  0xc4   :  { %v195_v27 = vadd.f32 %v194_v25, %v379_v22  ;;  %v110_v28 = vadd.f32 %v109_v26, %v371_v14  ;;  %v138_v29 = vpop.f32.mrf.mxu1 }
  0xc5   :  { %v139_v30 = vadd.f32 %v138_v29, %v373_v15 }
  0xc6   :  { %v212_v31 = vpack.c.bf16 %v195_v27, %v166_v24 }
  0xc7   :  { %v213_v32 = vpack.c.bf16 %v139_v30, %v110_v28 }
  0xc8   :  { %228 = vst [vmem:[#allocation2 + $0x68] sm:$0xff] %v212_v31 }
  0xc9   :  { %229 = vst [vmem:[#allocation2 + $0x70] sm:$0xff] %v213_v32 }
  0xca   :  { %v167_v33 = vpop.f32.mrf.mxu2 }
  0xcb   :  { %v168_v34 = vadd.f32 %v167_v33, %v377_v21  ;;  %v196_v35 = vpop.f32.mrf.mxu3 }
  0xcc   :  { %v197_v36 = vadd.f32 %v196_v35, %v379_v22 }
  0xce   :  { %v214_v14 = vpack.c.bf16 %v197_v36, %v168_v34 }
  0xd0   :  { %230 = vst [vmem:[#allocation2 + $0x78] sm:$0xff] %v214_v14 }
  0xd1   :  { %243 = dma.vmem_to_hbm [thread:$0]  %s236_s2, 2048, %s238_s25, [#allocation3], %s315_s26, %s315_s26, %s316_s27  }
  0xd2   :  { %312 = dma.done.wait [#allocation3], 2048  }
  0xd3   :  { %313 = vsyncadd [#allocation3], 4294965248 }
  0xd4   :  { %248 = vsyncpa [#allocation3], 1 }

</bundles_post_ra>
